<compile_context>
chip_gen: v6e
topology: v6e:2x2x1
jax: 0.10.0
libtpu: 0.0.40
codegen_flags: <defaults>
</compile_context>

<pallas_src>
import math
import functools

import jax
import jax.numpy as jnp
from jax.experimental import pallas as pl
from jax.experimental.pallas import tpu as pltpu


def _attn_kernel(x_ref, ext_ref, w_ref, b_ref, ctx_ref, probs_ref,
                 *, head_dim, heads_per_group, pv_dtype):
    """One (head-group, batch) tile per grid step.

    x_ref    : (1, S, H)       hidden states for this batch element
    ext_ref  : (1, 1, S)       precomputed (1 - mask) * (-10000) / sqrt(d)
    w_ref    : (3, H, GW)      stacked Q/K/V weight column-slab for this group
    b_ref    : (3, 1, GW)      stacked Q/K/V bias slab
    ctx_ref  : (1, S, GW)      context slice of the (B, S, H) output
    probs_ref: (1, HG, S, S)   attention probabilities for this group's heads
    """
    x = x_ref[0]        # (S, H)
    ext = ext_ref[0]    # (1, S) -> broadcasts over query rows

    # Full-width projections: contraction over all of H, output width GW.
    q = jnp.dot(x, w_ref[0], preferred_element_type=jnp.float32) + b_ref[0]
    k = jnp.dot(x, w_ref[1], preferred_element_type=jnp.float32) + b_ref[1]
    v = jnp.dot(x, w_ref[2], preferred_element_type=jnp.float32) + b_ref[2]

    ctx_parts = []
    for j in range(heads_per_group):        # static unroll, HG is small
        lo = j * head_dim
        hi = lo + head_dim
        qh = q[:, lo:hi]
        kh = k[:, lo:hi]
        vh = v[:, lo:hi]

        # f32 QK^T (see header comment), scale+mask already folded into ext.
        s = jnp.dot(qh, kh.T, preferred_element_type=jnp.float32)   # (S, S)
        s = s * ext

        # Numerically-stable softmax over keys.
        m = jnp.max(s, axis=-1, keepdims=True)
        e = jnp.exp(s - m)
        denom = jnp.sum(e, axis=-1, keepdims=True)
        p = e * pl.reciprocal(denom, approx=True)                   # EUP slot

        probs_ref[0, j, :, :] = p.astype(probs_ref.dtype)

        # probs @ V with bf16 inputs, f32 MXU accumulation.
        ctx_parts.append(
            jnp.dot(p.astype(pv_dtype), vh.astype(pv_dtype),
                    preferred_element_type=jnp.float32))

    ctx = ctx_parts[0] if len(ctx_parts) == 1 else jnp.concatenate(
        ctx_parts, axis=-1)
    ctx_ref[0] = ctx.astype(ctx_ref.dtype)   # single lane-dense (S, GW) store


def _heads_per_group(num_heads, head_dim):
    """Group heads so the group width is a multiple of 128 lanes if possible;
    otherwise process all heads together (block == full H, always legal)."""
    if head_dim % 128 == 0:
        return 1
    if 128 % head_dim == 0:
        cand = 128 // head_dim
        if cand <= num_heads and num_heads % cand == 0:
            return cand
    return num_heads


def self_attention_pallas(hidden_states, attention_mask,
                          wq, bq, wk, bk, wv, bv, num_heads,
                          *, pv_dtype=jnp.bfloat16):
    """hidden_states: (B, S, H) f32; attention_mask: (B, S) of 0/1.
    wq/wk/wv: (H, H) stored (in, out) so projection is x @ W + b
    (i.e. W = W_torch.T); bq/bk/bv: (H,)."""
    B, S, H = hidden_states.shape
    assert H % num_heads == 0
    d = H // num_heads
    hg = _heads_per_group(num_heads, d)
    gw = hg * d
    G = num_heads // hg

    # Heads occupy contiguous output columns of each weight, so a group of hg
    # consecutive heads is a contiguous (H, gw) column slab -> simple blocking.
    w_stack = jnp.stack([wq, wk, wv])                     # (3, H, H)
    b_stack = jnp.stack([bq, bk, bv]).reshape(3, 1, H)    # (3, 1, H)

    # Fold 1/sqrt(d) and the -10000 multiplier into one per-key row.
    ext_scaled = ((1.0 - attention_mask.astype(jnp.float32)) * (-10000.0)
                  / math.sqrt(d)).reshape(B, 1, S)

    kernel = functools.partial(_attn_kernel, head_dim=d,
                               heads_per_group=hg, pv_dtype=pv_dtype)

    # Rough per-step VMEM footprint (blocks are double-buffered) to size the
    # scoped-VMEM limit above the small 16/32 MiB defaults; clamp to 64 MiB so
    # it stays legal on v7x.
    f32 = 4
    blk = (S * H + S + 3 * H * gw + 3 * gw + S * gw + hg * S * S) * f32
    tmp = (3 * S * gw + 4 * S * S) * f32
    vmem_limit = int(min(64 * 2**20, max(32 * 2**20, 3 * blk + tmp)))

    ctx, probs = pl.pallas_call(
        kernel,
        out_shape=(
            jax.ShapeDtypeStruct((B, S, H), jnp.float32),
            jax.ShapeDtypeStruct((B, num_heads, S, S), jnp.float32),
        ),
        grid_spec=pltpu.PrefetchScalarGridSpec(
            num_scalar_prefetch=0,
            # Head-group outer, batch inner: the weight/bias block index only
            # depends on g, so the slab is fetched once per group and stays
            # resident across the batch loop.
            grid=(G, B),
            in_specs=[
                pl.BlockSpec((1, S, H), lambda g, b: (b, 0, 0)),    # x
                pl.BlockSpec((1, 1, S), lambda g, b: (b, 0, 0)),    # ext mask
                pl.BlockSpec((3, H, gw), lambda g, b: (0, 0, g)),   # W slab
                pl.BlockSpec((3, 1, gw), lambda g, b: (0, 0, g)),   # b slab
            ],
            out_specs=[
                pl.BlockSpec((1, S, gw), lambda g, b: (b, 0, g)),        # ctx
                pl.BlockSpec((1, hg, S, S), lambda g, b: (b, g, 0, 0)),  # probs
            ],
        ),
        compiler_params=pltpu.CompilerParams(
            dimension_semantics=("parallel", "parallel"),
            vmem_limit_bytes=vmem_limit),
    )(hidden_states, ext_scaled, w_stack, b_stack)

    return ctx, probs


def self_attention_reference(hidden_states, attention_mask,
                             wq, bq, wk, bk, wv, bv, num_heads):
    """Pure-JAX mirror of the PyTorch forward, for verification."""
    B, S, H = hidden_states.shape
    d = H // num_heads

    def proj(w, b):
        y = hidden_states @ w + b                                   # (B, S, H)
        return jnp.transpose(y.reshape(B, S, num_heads, d), (0, 2, 1, 3))

    q, k, v = proj(wq, bq), proj(wk, bk), proj(wv, bv)
    scores = jnp.einsum("bhqd,bhkd->bhqk", q, k) / math.sqrt(d)
    ext = (1.0 - attention_mask)[:, None, None, :] * (-10000.0)
    scores = scores * ext                       # faithful quirk: multiply
    probs = jax.nn.softmax(scores, axis=-1)
    ctx = jnp.einsum("bhqk,bhkd->bhqd", probs, v)
    ctx = jnp.transpose(ctx, (0, 2, 1, 3)).reshape(B, S, H)
    return ctx, probs


if __name__ == "__main__":
    # Small shapes: batch=2, seq=8, hidden=32, heads=4 (head dim 8).
    B, S, H, num_heads = 2, 8, 32, 4

    key = jax.random.PRNGKey(0)
    kx, km, k1, k2, k3, k4, k5, k6 = jax.random.split(key, 8)

    hidden_states = jax.random.normal(kx, (B, S, H), dtype=jnp.float32)
    attention_mask = (jax.random.uniform(km, (B, S)) > 0.25).astype(jnp.float32)

    # Deterministic nn.Linear-style init: U(-1/sqrt(H), 1/sqrt(H)).
    bound = 1.0 / math.sqrt(H)
    wq = jax.random.uniform(k1, (H, H), minval=-bound, maxval=bound, dtype=jnp.float32)
    wk = jax.random.uniform(k2, (H, H), minval=-bound, maxval=bound, dtype=jnp.float32)
    wv = jax.random.uniform(k3, (H, H), minval=-bound, maxval=bound, dtype=jnp.float32)
    bq = jax.random.uniform(k4, (H,), minval=-bound, maxval=bound, dtype=jnp.float32)
    bk = jax.random.uniform(k5, (H,), minval=-bound, maxval=bound, dtype=jnp.float32)
    bv = jax.random.uniform(k6, (H,), minval=-bound, maxval=bound, dtype=jnp.float32)

    ctx, probs = self_attention_pallas(hidden_states, attention_mask,
                                       wq, bq, wk, bk, wv, bv, num_heads)
    jax.block_until_ready((ctx, probs))

    ctx_ref, probs_ref = self_attention_reference(hidden_states, attention_mask,
                                                  wq, bq, wk, bk, wv, bv, num_heads)

    assert ctx.shape == (B, S, H)
    assert probs.shape == (B, num_heads, S, S)
    # Tolerances loosened vs pure-f32: approx reciprocal (EUP) for the softmax
    # denominator and bf16 inputs for the probs@V matmul (f32 accumulation).
    assert jnp.allclose(probs, probs_ref, atol=1e-2, rtol=1e-2)
    assert jnp.allclose(ctx, ctx_ref, atol=3e-2, rtol=3e-2)

    print("KERNEL_OK")
</pallas_src>

<mosaic_0001>
module attributes {stable_mosaic.version = 11 : i64} {
  func.func @_attn_kernel(%arg0: i32, %arg1: i32, %arg2: memref<1x8x32xf32, #tpu.memory_space<vmem>>, %arg3: memref<1x1x8xf32, #tpu.memory_space<vmem>>, %arg4: memref<3x32x32xf32, #tpu.memory_space<vmem>>, %arg5: memref<3x1x32xf32, #tpu.memory_space<vmem>>, %arg6: memref<1x8x32xf32, #tpu.memory_space<vmem>>, %arg7: memref<1x4x8x8xf32, #tpu.memory_space<vmem>>) attributes {dimension_semantics = [#tpu.dimension_semantics<parallel>, #tpu.dimension_semantics<parallel>], iteration_bounds = array<i64: 1, 2>, scalar_prefetch = 0 : i64, scratch_operands = 0 : i64, tpu.core_type = #tpu.core_type<tc>, window_params = [{transform_indices = @transform_0, window_bounds = array<i64: 1, 8, 32>}, {transform_indices = @transform_1, window_bounds = array<i64: 1, 1, 8>}, {transform_indices = @transform_2, window_bounds = array<i64: 3, 32, 32>}, {transform_indices = @transform_3, window_bounds = array<i64: 3, 1, 32>}, {transform_indices = @transform_4, window_bounds = array<i64: 1, 8, 32>}, {transform_indices = @transform_5, window_bounds = array<i64: 1, 4, 8, 8>}]} {
    %c0 = arith.constant 0 : index
    %c0_0 = arith.constant 0 : index
    %c0_1 = arith.constant 0 : index
    %0 = vector.load %arg2[%c0, %c0_0, %c0_1] : memref<1x8x32xf32, #tpu.memory_space<vmem>>, vector<1x8x32xf32>
    %1 = vector.shape_cast %0 : vector<1x8x32xf32> to vector<8x32xf32>
    %c0_2 = arith.constant 0 : index
    %c0_3 = arith.constant 0 : index
    %c0_4 = arith.constant 0 : index
    %2 = vector.load %arg3[%c0_2, %c0_3, %c0_4] : memref<1x1x8xf32, #tpu.memory_space<vmem>>, vector<1x1x8xf32>
    %3 = vector.shape_cast %2 : vector<1x1x8xf32> to vector<1x8xf32>
    %c0_5 = arith.constant 0 : index
    %c0_6 = arith.constant 0 : index
    %c0_7 = arith.constant 0 : index
    %4 = vector.load %arg4[%c0_5, %c0_6, %c0_7] : memref<3x32x32xf32, #tpu.memory_space<vmem>>, vector<1x32x32xf32>
    %5 = vector.shape_cast %4 : vector<1x32x32xf32> to vector<32x32xf32>
    %cst = arith.constant dense<0.000000e+00> : vector<8x32xf32>
    %6 = tpu.matmul %1, %5, %cst {dimension_numbers = #tpu.dot_dimension_numbers<[1], [0], [0], [1], [0, 0, 1, 1], [], []>} : vector<8x32xf32>, vector<32x32xf32>, vector<8x32xf32> -> vector<8x32xf32>
    %c0_8 = arith.constant 0 : index
    %c0_9 = arith.constant 0 : index
    %c0_10 = arith.constant 0 : index
    %7 = vector.load %arg5[%c0_8, %c0_9, %c0_10] : memref<3x1x32xf32, #tpu.memory_space<vmem>>, vector<1x1x32xf32>
    %8 = vector.shape_cast %7 : vector<1x1x32xf32> to vector<1x32xf32>
    %9 = vector.broadcast %8 : vector<1x32xf32> to vector<8x32xf32>
    %10 = arith.addf %6, %9 : vector<8x32xf32>
    %c1 = arith.constant 1 : index
    %c0_11 = arith.constant 0 : index
    %c0_12 = arith.constant 0 : index
    %11 = vector.load %arg4[%c1, %c0_11, %c0_12] : memref<3x32x32xf32, #tpu.memory_space<vmem>>, vector<1x32x32xf32>
    %12 = vector.shape_cast %11 : vector<1x32x32xf32> to vector<32x32xf32>
    %cst_13 = arith.constant dense<0.000000e+00> : vector<8x32xf32>
    %13 = tpu.matmul %1, %12, %cst_13 {dimension_numbers = #tpu.dot_dimension_numbers<[1], [0], [0], [1], [0, 0, 1, 1], [], []>} : vector<8x32xf32>, vector<32x32xf32>, vector<8x32xf32> -> vector<8x32xf32>
    %c1_14 = arith.constant 1 : index
    %c0_15 = arith.constant 0 : index
    %c0_16 = arith.constant 0 : index
    %14 = vector.load %arg5[%c1_14, %c0_15, %c0_16] : memref<3x1x32xf32, #tpu.memory_space<vmem>>, vector<1x1x32xf32>
    %15 = vector.shape_cast %14 : vector<1x1x32xf32> to vector<1x32xf32>
    %16 = vector.broadcast %15 : vector<1x32xf32> to vector<8x32xf32>
    %17 = arith.addf %13, %16 : vector<8x32xf32>
    %c2 = arith.constant 2 : index
    %c0_17 = arith.constant 0 : index
    %c0_18 = arith.constant 0 : index
    %18 = vector.load %arg4[%c2, %c0_17, %c0_18] : memref<3x32x32xf32, #tpu.memory_space<vmem>>, vector<1x32x32xf32>
    %19 = vector.shape_cast %18 : vector<1x32x32xf32> to vector<32x32xf32>
    %cst_19 = arith.constant dense<0.000000e+00> : vector<8x32xf32>
    %20 = tpu.matmul %1, %19, %cst_19 {dimension_numbers = #tpu.dot_dimension_numbers<[1], [0], [0], [1], [0, 0, 1, 1], [], []>} : vector<8x32xf32>, vector<32x32xf32>, vector<8x32xf32> -> vector<8x32xf32>
    %c2_20 = arith.constant 2 : index
    %c0_21 = arith.constant 0 : index
    %c0_22 = arith.constant 0 : index
    %21 = vector.load %arg5[%c2_20, %c0_21, %c0_22] : memref<3x1x32xf32, #tpu.memory_space<vmem>>, vector<1x1x32xf32>
    %22 = vector.shape_cast %21 : vector<1x1x32xf32> to vector<1x32xf32>
    %23 = vector.broadcast %22 : vector<1x32xf32> to vector<8x32xf32>
    %24 = arith.addf %20, %23 : vector<8x32xf32>
    %25 = vector.extract_strided_slice %10 {offsets = [0, 0], sizes = [8, 8], strides = [1, 1]} : vector<8x32xf32> to vector<8x8xf32>
    %26 = vector.extract_strided_slice %17 {offsets = [0, 0], sizes = [8, 8], strides = [1, 1]} : vector<8x32xf32> to vector<8x8xf32>
    %27 = vector.extract_strided_slice %24 {offsets = [0, 0], sizes = [8, 8], strides = [1, 1]} : vector<8x32xf32> to vector<8x8xf32>
    %28 = tpu.transpose %26, [1, 0] : vector<8x8xf32> -> vector<8x8xf32>
    %cst_23 = arith.constant dense<0.000000e+00> : vector<8x8xf32>
    %29 = tpu.matmul %25, %28, %cst_23 {dimension_numbers = #tpu.dot_dimension_numbers<[1], [0], [0], [1], [0, 0, 1, 1], [], []>} : vector<8x8xf32>, vector<8x8xf32>, vector<8x8xf32> -> vector<8x8xf32>
    %30 = vector.broadcast %3 : vector<1x8xf32> to vector<8x8xf32>
    %31 = arith.mulf %29, %30 : vector<8x8xf32>
    %cst_24 = arith.constant dense<0xFF800000> : vector<8xf32>
    %32 = vector.multi_reduction <maximumf>, %31, %cst_24 [1] : vector<8x8xf32> to vector<8xf32>
    %33 = vector.shape_cast %32 : vector<8xf32> to vector<8x1xf32>
    %34 = vector.broadcast %33 : vector<8x1xf32> to vector<8x8xf32>
    %35 = arith.subf %31, %34 : vector<8x8xf32>
    %36 = math.exp %35 : vector<8x8xf32>
    %cst_25 = arith.constant dense<0.000000e+00> : vector<8xf32>
    %37 = vector.multi_reduction <add>, %36, %cst_25 [1] : vector<8x8xf32> to vector<8xf32>
    %38 = vector.shape_cast %37 : vector<8xf32> to vector<8x1xf32>
    %39 = tpu.reciprocal %38 {approx = true} : vector<8x1xf32> -> vector<8x1xf32>
    %40 = vector.broadcast %39 : vector<8x1xf32> to vector<8x8xf32>
    %41 = arith.mulf %36, %40 : vector<8x8xf32>
    %c0_26 = arith.constant 0 : index
    %c0_27 = arith.constant 0 : index
    %c0_28 = arith.constant 0 : index
    %c0_29 = arith.constant 0 : index
    %42 = vector.load %arg7[%c0_26, %c0_27, %c0_28, %c0_29] : memref<1x4x8x8xf32, #tpu.memory_space<vmem>>, vector<1x1x8x8xf32>
    %43 = vector.shape_cast %42 : vector<1x1x8x8xf32> to vector<8x8xf32>
    %44 = vector.shape_cast %41 : vector<8x8xf32> to vector<1x1x8x8xf32>
    tpu.vector_store %arg7[%c0_26, %c0_27, %c0_28, %c0_29], %44 {strides = array<i32>} : memref<1x4x8x8xf32, #tpu.memory_space<vmem>>, vector<1x1x8x8xf32>,
    %45 = arith.truncf %41 : vector<8x8xf32> to vector<8x8xbf16>
    %46 = arith.truncf %27 : vector<8x8xf32> to vector<8x8xbf16>
    %cst_30 = arith.constant dense<0.000000e+00> : vector<8x8xf32>
    %47 = tpu.matmul %45, %46, %cst_30 {dimension_numbers = #tpu.dot_dimension_numbers<[1], [0], [0], [1], [0, 0, 1, 1], [], []>} : vector<8x8xbf16>, vector<8x8xbf16>, vector<8x8xf32> -> vector<8x8xf32>
    %48 = vector.extract_strided_slice %10 {offsets = [0, 8], sizes = [8, 8], strides = [1, 1]} : vector<8x32xf32> to vector<8x8xf32>
    %49 = vector.extract_strided_slice %17 {offsets = [0, 8], sizes = [8, 8], strides = [1, 1]} : vector<8x32xf32> to vector<8x8xf32>
    %50 = vector.extract_strided_slice %24 {offsets = [0, 8], sizes = [8, 8], strides = [1, 1]} : vector<8x32xf32> to vector<8x8xf32>
    %51 = tpu.transpose %49, [1, 0] : vector<8x8xf32> -> vector<8x8xf32>
    %cst_31 = arith.constant dense<0.000000e+00> : vector<8x8xf32>
    %52 = tpu.matmul %48, %51, %cst_31 {dimension_numbers = #tpu.dot_dimension_numbers<[1], [0], [0], [1], [0, 0, 1, 1], [], []>} : vector<8x8xf32>, vector<8x8xf32>, vector<8x8xf32> -> vector<8x8xf32>
    %53 = vector.broadcast %3 : vector<1x8xf32> to vector<8x8xf32>
    %54 = arith.mulf %52, %53 : vector<8x8xf32>
    %cst_32 = arith.constant dense<0xFF800000> : vector<8xf32>
    %55 = vector.multi_reduction <maximumf>, %54, %cst_32 [1] : vector<8x8xf32> to vector<8xf32>
    %56 = vector.shape_cast %55 : vector<8xf32> to vector<8x1xf32>
    %57 = vector.broadcast %56 : vector<8x1xf32> to vector<8x8xf32>
    %58 = arith.subf %54, %57 : vector<8x8xf32>
    %59 = math.exp %58 : vector<8x8xf32>
    %cst_33 = arith.constant dense<0.000000e+00> : vector<8xf32>
    %60 = vector.multi_reduction <add>, %59, %cst_33 [1] : vector<8x8xf32> to vector<8xf32>
    %61 = vector.shape_cast %60 : vector<8xf32> to vector<8x1xf32>
    %62 = tpu.reciprocal %61 {approx = true} : vector<8x1xf32> -> vector<8x1xf32>
    %63 = vector.broadcast %62 : vector<8x1xf32> to vector<8x8xf32>
    %64 = arith.mulf %59, %63 : vector<8x8xf32>
    %c0_34 = arith.constant 0 : index
    %c1_35 = arith.constant 1 : index
    %c0_36 = arith.constant 0 : index
    %c0_37 = arith.constant 0 : index
    %65 = vector.load %arg7[%c0_34, %c1_35, %c0_36, %c0_37] : memref<1x4x8x8xf32, #tpu.memory_space<vmem>>, vector<1x1x8x8xf32>
    %66 = vector.shape_cast %65 : vector<1x1x8x8xf32> to vector<8x8xf32>
    %67 = vector.shape_cast %64 : vector<8x8xf32> to vector<1x1x8x8xf32>
    tpu.vector_store %arg7[%c0_34, %c1_35, %c0_36, %c0_37], %67 {strides = array<i32>} : memref<1x4x8x8xf32, #tpu.memory_space<vmem>>, vector<1x1x8x8xf32>,
    %68 = arith.truncf %64 : vector<8x8xf32> to vector<8x8xbf16>
    %69 = arith.truncf %50 : vector<8x8xf32> to vector<8x8xbf16>
    %cst_38 = arith.constant dense<0.000000e+00> : vector<8x8xf32>
    %70 = tpu.matmul %68, %69, %cst_38 {dimension_numbers = #tpu.dot_dimension_numbers<[1], [0], [0], [1], [0, 0, 1, 1], [], []>} : vector<8x8xbf16>, vector<8x8xbf16>, vector<8x8xf32> -> vector<8x8xf32>
    %71 = vector.extract_strided_slice %10 {offsets = [0, 16], sizes = [8, 8], strides = [1, 1]} : vector<8x32xf32> to vector<8x8xf32>
    %72 = vector.extract_strided_slice %17 {offsets = [0, 16], sizes = [8, 8], strides = [1, 1]} : vector<8x32xf32> to vector<8x8xf32>
    %73 = vector.extract_strided_slice %24 {offsets = [0, 16], sizes = [8, 8], strides = [1, 1]} : vector<8x32xf32> to vector<8x8xf32>
    %74 = tpu.transpose %72, [1, 0] : vector<8x8xf32> -> vector<8x8xf32>
    %cst_39 = arith.constant dense<0.000000e+00> : vector<8x8xf32>
    %75 = tpu.matmul %71, %74, %cst_39 {dimension_numbers = #tpu.dot_dimension_numbers<[1], [0], [0], [1], [0, 0, 1, 1], [], []>} : vector<8x8xf32>, vector<8x8xf32>, vector<8x8xf32> -> vector<8x8xf32>
    %76 = vector.broadcast %3 : vector<1x8xf32> to vector<8x8xf32>
    %77 = arith.mulf %75, %76 : vector<8x8xf32>
    %cst_40 = arith.constant dense<0xFF800000> : vector<8xf32>
    %78 = vector.multi_reduction <maximumf>, %77, %cst_40 [1] : vector<8x8xf32> to vector<8xf32>
    %79 = vector.shape_cast %78 : vector<8xf32> to vector<8x1xf32>
    %80 = vector.broadcast %79 : vector<8x1xf32> to vector<8x8xf32>
    %81 = arith.subf %77, %80 : vector<8x8xf32>
    %82 = math.exp %81 : vector<8x8xf32>
    %cst_41 = arith.constant dense<0.000000e+00> : vector<8xf32>
    %83 = vector.multi_reduction <add>, %82, %cst_41 [1] : vector<8x8xf32> to vector<8xf32>
    %84 = vector.shape_cast %83 : vector<8xf32> to vector<8x1xf32>
    %85 = tpu.reciprocal %84 {approx = true} : vector<8x1xf32> -> vector<8x1xf32>
    %86 = vector.broadcast %85 : vector<8x1xf32> to vector<8x8xf32>
    %87 = arith.mulf %82, %86 : vector<8x8xf32>
    %c0_42 = arith.constant 0 : index
    %c2_43 = arith.constant 2 : index
    %c0_44 = arith.constant 0 : index
    %c0_45 = arith.constant 0 : index
    %88 = vector.load %arg7[%c0_42, %c2_43, %c0_44, %c0_45] : memref<1x4x8x8xf32, #tpu.memory_space<vmem>>, vector<1x1x8x8xf32>
    %89 = vector.shape_cast %88 : vector<1x1x8x8xf32> to vector<8x8xf32>
    %90 = vector.shape_cast %87 : vector<8x8xf32> to vector<1x1x8x8xf32>
    tpu.vector_store %arg7[%c0_42, %c2_43, %c0_44, %c0_45], %90 {strides = array<i32>} : memref<1x4x8x8xf32, #tpu.memory_space<vmem>>, vector<1x1x8x8xf32>,
    %91 = arith.truncf %87 : vector<8x8xf32> to vector<8x8xbf16>
    %92 = arith.truncf %73 : vector<8x8xf32> to vector<8x8xbf16>
    %cst_46 = arith.constant dense<0.000000e+00> : vector<8x8xf32>
    %93 = tpu.matmul %91, %92, %cst_46 {dimension_numbers = #tpu.dot_dimension_numbers<[1], [0], [0], [1], [0, 0, 1, 1], [], []>} : vector<8x8xbf16>, vector<8x8xbf16>, vector<8x8xf32> -> vector<8x8xf32>
    %94 = vector.extract_strided_slice %10 {offsets = [0, 24], sizes = [8, 8], strides = [1, 1]} : vector<8x32xf32> to vector<8x8xf32>
    %95 = vector.extract_strided_slice %17 {offsets = [0, 24], sizes = [8, 8], strides = [1, 1]} : vector<8x32xf32> to vector<8x8xf32>
    %96 = vector.extract_strided_slice %24 {offsets = [0, 24], sizes = [8, 8], strides = [1, 1]} : vector<8x32xf32> to vector<8x8xf32>
    %97 = tpu.transpose %95, [1, 0] : vector<8x8xf32> -> vector<8x8xf32>
    %cst_47 = arith.constant dense<0.000000e+00> : vector<8x8xf32>
    %98 = tpu.matmul %94, %97, %cst_47 {dimension_numbers = #tpu.dot_dimension_numbers<[1], [0], [0], [1], [0, 0, 1, 1], [], []>} : vector<8x8xf32>, vector<8x8xf32>, vector<8x8xf32> -> vector<8x8xf32>
    %99 = vector.broadcast %3 : vector<1x8xf32> to vector<8x8xf32>
    %100 = arith.mulf %98, %99 : vector<8x8xf32>
    %cst_48 = arith.constant dense<0xFF800000> : vector<8xf32>
    %101 = vector.multi_reduction <maximumf>, %100, %cst_48 [1] : vector<8x8xf32> to vector<8xf32>
    %102 = vector.shape_cast %101 : vector<8xf32> to vector<8x1xf32>
    %103 = vector.broadcast %102 : vector<8x1xf32> to vector<8x8xf32>
    %104 = arith.subf %100, %103 : vector<8x8xf32>
    %105 = math.exp %104 : vector<8x8xf32>
    %cst_49 = arith.constant dense<0.000000e+00> : vector<8xf32>
    %106 = vector.multi_reduction <add>, %105, %cst_49 [1] : vector<8x8xf32> to vector<8xf32>
    %107 = vector.shape_cast %106 : vector<8xf32> to vector<8x1xf32>
    %108 = tpu.reciprocal %107 {approx = true} : vector<8x1xf32> -> vector<8x1xf32>
    %109 = vector.broadcast %108 : vector<8x1xf32> to vector<8x8xf32>
    %110 = arith.mulf %105, %109 : vector<8x8xf32>
    %c0_50 = arith.constant 0 : index
    %c3 = arith.constant 3 : index
    %c0_51 = arith.constant 0 : index
    %c0_52 = arith.constant 0 : index
    %111 = vector.load %arg7[%c0_50, %c3, %c0_51, %c0_52] : memref<1x4x8x8xf32, #tpu.memory_space<vmem>>, vector<1x1x8x8xf32>
    %112 = vector.shape_cast %111 : vector<1x1x8x8xf32> to vector<8x8xf32>
    %113 = vector.shape_cast %110 : vector<8x8xf32> to vector<1x1x8x8xf32>
    tpu.vector_store %arg7[%c0_50, %c3, %c0_51, %c0_52], %113 {strides = array<i32>} : memref<1x4x8x8xf32, #tpu.memory_space<vmem>>, vector<1x1x8x8xf32>,
    %114 = arith.truncf %110 : vector<8x8xf32> to vector<8x8xbf16>
    %115 = arith.truncf %96 : vector<8x8xf32> to vector<8x8xbf16>
    %cst_53 = arith.constant dense<0.000000e+00> : vector<8x8xf32>
    %116 = tpu.matmul %114, %115, %cst_53 {dimension_numbers = #tpu.dot_dimension_numbers<[1], [0], [0], [1], [0, 0, 1, 1], [], []>} : vector<8x8xbf16>, vector<8x8xbf16>, vector<8x8xf32> -> vector<8x8xf32>
    %117 = tpu.concatenate %47, %70, %93, %116 in 1 : vector<8x8xf32>, vector<8x8xf32>, vector<8x8xf32>, vector<8x8xf32> -> vector<8x32xf32>
    %c0_54 = arith.constant 0 : index
    %c0_55 = arith.constant 0 : index
    %c0_56 = arith.constant 0 : index
    %118 = vector.load %arg6[%c0_54, %c0_55, %c0_56] : memref<1x8x32xf32, #tpu.memory_space<vmem>>, vector<1x8x32xf32>
    %119 = vector.shape_cast %118 : vector<1x8x32xf32> to vector<8x32xf32>
    %120 = vector.shape_cast %117 : vector<8x32xf32> to vector<1x8x32xf32>
    tpu.vector_store %arg6[%c0_54, %c0_55, %c0_56], %120 {strides = array<i32>} : memref<1x8x32xf32, #tpu.memory_space<vmem>>, vector<1x8x32xf32>,
    return
  }
  func.func @transform_0(%arg0: i32, %arg1: i32) -> (i32, i32, i32) {
    %c0_i32 = arith.constant 0 : i32
    %c0_i32_0 = arith.constant 0 : i32
    %c0_i32_1 = arith.constant 0 : i32
    return %arg1, %c0_i32, %c0_i32_0 : i32, i32, i32
  }
  func.func @transform_1(%arg0: i32, %arg1: i32) -> (i32, i32, i32) {
    %c0_i32 = arith.constant 0 : i32
    %c0_i32_0 = arith.constant 0 : i32
    %c0_i32_1 = arith.constant 0 : i32
    return %arg1, %c0_i32, %c0_i32_0 : i32, i32, i32
  }
  func.func @transform_2(%arg0: i32, %arg1: i32) -> (i32, i32, i32) {
    %c0_i32 = arith.constant 0 : i32
    %c0_i32_0 = arith.constant 0 : i32
    %c0_i32_1 = arith.constant 0 : i32
    return %c0_i32, %c0_i32_0, %arg0 : i32, i32, i32
  }
  func.func @transform_3(%arg0: i32, %arg1: i32) -> (i32, i32, i32) {
    %c0_i32 = arith.constant 0 : i32
    %c0_i32_0 = arith.constant 0 : i32
    %c0_i32_1 = arith.constant 0 : i32
    return %c0_i32, %c0_i32_0, %arg0 : i32, i32, i32
  }
  func.func @transform_4(%arg0: i32, %arg1: i32) -> (i32, i32, i32) {
    %c0_i32 = arith.constant 0 : i32
    %c0_i32_0 = arith.constant 0 : i32
    return %arg1, %c0_i32, %arg0 : i32, i32, i32
  }
  func.func @transform_5(%arg0: i32, %arg1: i32) -> (i32, i32, i32, i32) {
    %c0_i32 = arith.constant 0 : i32
    %c0_i32_0 = arith.constant 0 : i32
    %c0_i32_1 = arith.constant 0 : i32
    return %arg1, %arg0, %c0_i32, %c0_i32_0 : i32, i32, i32, i32
  }
}

</mosaic_0001>

<bundles_post_ra>
// kernel: tpu_custom_call.1
= control target key start
LH: loop header
LB: loop body
LE: loop exit
PB: predicated region body
PF: predicated region fallthrough
CT: control target
= control target key end

     0   :  { %s2243_s0 = inlined_call_operand.hbm [shape: f32[2,8,32], index: 0, kind: input, shape index: {}]   ;;  %s2244_s1 = inlined_call_operand.hbm [shape: f32[2,1,8], index: 1, kind: input, shape index: {}]   ;;  %s2245_s2 = inlined_call_operand.hbm [shape: f32[3,32,32], index: 2, kind: input, shape index: {}]   ;;  %s2246_s3 = inlined_call_operand.vmem [shape: f32[3,1,32], index: 3, kind: input, shape index: {}]   ;;  %s2247_s4 = inlined_call_operand.hbm [shape: f32[2,8,32], index: 4, kind: output, shape index: {0}]   ;;  %s2248_s5 = inlined_call_operand.hbm [shape: f32[2,4,8,8], index: 5, kind: output, shape index: {1}]  }
   0x1   :  { %2251 = sst [smem:[#allocation19_spill]] %s2243_s0 }
   0x2   :  { %2252 = sst [smem:[#allocation20_spill]] %s2245_s2 }
   0x3   :  { %11 = vsyncpa [#allocation3], 0 }
   0x4   :  { %13 = vsyncpa [#allocation3 + $0x1], 0 }
   0x5   :  { %14 = vsyncpa [#allocation6], 0 }
   0x6   :  { %16 = vsyncpa [#allocation6 + $0x1], 0 }
   0x7   :  { %17 = vsyncpa [#allocation4], 0 }
   0x8   :  { %19 = vsyncpa [#allocation4 + $0x1], 0 }
   0x9   :  { %20 = vsyncpa [#allocation10], 0 }
   0xa   :  { %22 = vsyncpa [#allocation10 + $0x1], 0  ;;  %s1885_s18 = smov 0   ;;  %s1887_s19 = smov 0  }
   0xb   :  { %s1889_s20 = smov 0   ;;  %s1891_s21 = smov 0  }
   0xc   :  { %s1893_s22 = smov 0   ;;  %s1895_s23 = smov 0  }
   0xd LB: > { %2253 = sst [smem:[#allocation16_spill]] %s1825_s20  ;;  %s1916_s24 = sadd.s32 4294967295, %s1837_s23   ;;  %s1837_s23 = sphi %s1895_s23, %s28_s23   ;;  %s1833_s22 = sphi %s1893_s22, %s2273_s22   ;;  %s1829_s21 = sphi %s1891_s21, %s2272_s21   ;;  %s1825_s20 = sphi %s1889_s20, %s2268_s20   ;;  %s1821_s19 = sphi %s1887_s19, %s2271_s19   ;;  %s1817_s18 = sphi %s1885_s18, %s2270_s18  }
   0xe   : > { %s1374_s25 = sadd.s32 4294967294, %s1837_s23   ;;  %p60_p0 = scmp.ne.s32.totalorder %s1821_s19, %s1817_s18 }
   0xf   : > { %p61_p1 = scmp.eq.s32.totalorder %s1916_s24, 0  ;;  %p170_p3 = scmp.eq.s32.totalorder %s1374_s25, 1 }
  0x10   : > { %p1375_p5 = scmp.ge.s32.totalorder %s1837_s23, 1  ;;  %p205_p7 = scmp.lt.s32.totalorder %s1837_s23, 3 }
  0x11   : > { %p1925_p4 = por %p61_p1, %p60_p0  ;;  %p1930_p6 = por %p170_p3, %p60_p0 }
  0x12   : > { %p1935_p8 = pnand %p1375_p5, %p205_p7  ;;  %s1839_s29 = smov [#allocation7]  }
  0x13   : > { %s2255_s27 = scalar_select %p1930_p6, 1, 0 }
  0x14   : > { %s219_s30 = sshll.u32 %s1839_s29, 4  ;;  %p1539_p9 = pneg %p1935_p8  ;;  %s220_s30 = int_to_ptr.vmem [resolvable:$true] %s219_s30 }
  0x15   : > { %p1378_p10 = scmp.ge.s32.totalorder %s1837_s23, 2  ;;  %s37_s7 = sadd.s32 1, %s1833_s22 }
  0x16   : > { %p1944_p11 = pnand %p1539_p9, %p61_p1  ;;  %s1648_s8 = scalar_lea.vmem %s220_s30, 1536 }
  0x17   : > { %p1649_p13 = scmp.ne.s32.totalorder %s220_s30, %s1648_s8  ;;  %p1656_p5 = scmp.lt.s32.totalorder %s220_s30, %s220_s30 }
  0x18   : > { %p1639_p12 = pneg %p1944_p11  ;;  %p1657_p7 = scmp.lt.s32.totalorder %s1648_s8, %s1648_s8 }
  0x1a   : > { %p1651_p0 = pnand %p1649_p13, %p1639_p12  ;;  %p1658_p2 = por %p1657_p7, %p1656_p5 }
  0x1c   : > { %p1652_p3 = pneg %p1651_p0 }
  0x1e   : > { %p1659_p6 = pnand %p1658_p2, %p1652_p3 }
  0x20   : > { %1662 = shalt.err (!%p1659_p6)
}
  0x21   : > { %s1840_s9 = smov 128   ;;  %s1841_s10 = smov 8  }
  0x22   : > { %s2258_s2 = sld [smem:[#allocation20_spill]]  ;;  %p38_p2 = scmp.ge.s32.totalorder %s37_s7, 2 }
  0x23   : > { %s47_s13 = sadd.s32 1, %s1825_s20  ;;  %p54_p6 = scmp.ne.s32.totalorder %s1825_s20, %s1821_s19 }
  0x24   : > { %p55_p9 = scmp.eq.s32.totalorder %s1837_s23, 0  ;;  %s2275_s7 = smov (%p38_p2, %s37_s7), 0 }
  0x25   : > { %2259 = sst [smem:[#allocation17_spill]] %s2275_s7  ;;  %p2261_p13 = scmp.eq.s32.totalorder %s1916_s24, 1 }
  0x26   : > { %p1962_p12 = por %p55_p9, %p54_p6  ;;  %s44_s16 = ssub.s32 %s1833_s22, %s2275_s7 }
  0x27   : > { %p1968_p0 = por %p2261_p13, %p54_p6  ;;  %p45_p3 = scmp.eq.s32.totalorder %s44_s16, 0 }
  0x28   : > { %1542 = dma.hbm_to_vmem [thread:$0]  (!%p1944_p11), %s2258_s2, 1536, %s220_s30, [#allocation6], %s1840_s9, %s1840_s9, %s1841_s10  }
  0x29   : > { %p1558_p11 = scmp.lt.s32.totalorder %s1837_s23, 2  ;;  %s239_s17 = sand.u32 1, %s1825_s20  }
  0x2a   : > { %s1379_s25 = sshll.u32 %s239_s17, 3  ;;  %s1380_s30 = sshll.u32 %s1833_s22, 7 }
  0x2b   : > { %s1977_s29 = scalar_select %p45_p3, %s1825_s20, %s47_s13  }
  0x2c   : > { %s2264_s0 = sld [smem:[#allocation19_spill]]  ;;  %s243_s10 = scalar_lea.vmem [#allocation2], %s1379_s25 }
  0x2d   : > { %2263 = sst [smem:[#allocation18_spill]] %s1977_s29  ;;  %s250_s11 = sshll.u32 %s243_s10, 4  ;;  %s251_s11 = int_to_ptr.vmem [resolvable:$true] %s250_s11 }
  0x2e   : > { %p1985_p5 = pnand %p1558_p11, %p1962_p12  ;;  %s257_s16 = sand.u32 1, %s1837_s23  }
  0x2f   : > { %s240_s2 = scalar_lea.sflag [#allocation3], %s239_s17  ;;  %s1676_s13 = scalar_lea.vmem %s251_s11, 128 }
  0x30   : > { %p1665_p7 = pneg %p1985_p5  ;;  %p1677_p2 = scmp.ne.s32.totalorder %s251_s11, %s1676_s13 }
  0x31   : > { %s1842_s25 = smov [#allocation2]  }
  0x32   : > { %s248_s9 = scalar_lea.hbm %s2264_s0, %s1380_s30  ;;  %p1679_p6 = pnand %p1677_p2, %p1665_p7 }
  0x33   : > { %s1681_s30 = sshll.u32 %s1842_s25, 4  ;;  %s1682_s30 = int_to_ptr.vmem [resolvable:$false] %s1681_s30 }
  0x34   : > { %p1680_p9 = pneg %p1679_p6  ;;  %s1683_s14 = scalar_lea.vmem %s1682_s30, 256 }
  0x35   : > { %p1684_p12 = scmp.lt.s32.totalorder %s251_s11, %s1682_s30  ;;  %p1685_p13 = scmp.lt.s32.totalorder %s1683_s14, %s1676_s13 }
  0x37   : > { %p1686_p11 = por %p1685_p13, %p1684_p12 }
  0x39   : > { %p1687_p3 = pnand %p1686_p11, %p1680_p9 }
  0x3b   : > { %1690 = shalt.err (!%p1687_p3)
}
  0x3c   : > { %1546 = dma.hbm_to_vmem [thread:$0]  (!%p1985_p5), %s248_s9, 128, %s251_s11, %s240_s2  }
  0x3d   : > { %s1381_s6 = sshll.u32 %s1833_s22, 4  ;;  %s260_s8 = scalar_lea.vmem [#allocation5], %s239_s17 }
  0x3e   : > { %s267_s10 = sshll.u32 %s260_s8, 4  ;;  %s265_s29 = scalar_lea.hbm %s2244_s1, %s1381_s6  ;;  %s268_s10 = int_to_ptr.vmem [resolvable:$true] %s267_s10 }
  0x3f   : > { %s258_s25 = scalar_lea.sflag [#allocation6], %s257_s16  ;;  %s1704_s20 = scalar_lea.vmem %s268_s10, 16 }
  0x40   : > { %p1705_p2 = scmp.ne.s32.totalorder %s268_s10, %s1704_s20  ;;  %s1843_s13 = smov [#allocation5]  }
  0x41   : > { %s1709_s30 = sshll.u32 %s1843_s13, 4  ;;  %s1710_s30 = int_to_ptr.vmem [resolvable:$false] %s1709_s30 }
  0x42   : > { %p1707_p6 = pnand %p1705_p2, %p1665_p7  ;;  %s1711_s14 = scalar_lea.vmem %s1710_s30, 32 }
  0x43   : > { %p1712_p12 = scmp.lt.s32.totalorder %s268_s10, %s1710_s30  ;;  %p1713_p13 = scmp.lt.s32.totalorder %s1711_s14, %s1704_s20 }
  0x44   : > { %p1708_p9 = pneg %p1707_p6 }
  0x45   : > { %p1714_p11 = por %p1713_p13, %p1712_p12 }
  0x47   : > { %p1715_p3 = pnand %p1714_p11, %p1708_p9 }
  0x49   : > { %1718 = shalt.err (!%p1715_p3)
}
  0x4a   : > { %1549 = dma.hbm_to_vmem [thread:$0]  (!%p1985_p5), %s265_s29, 16, %s268_s10, %s258_s25  }
  0x4b   : > { %276 = sbr.rel (%p1935_p8) target bundleno = 2166 (0x876), region = 36  ;;  %s2009_s0 = sand.u32 (!%p1935_p8), 1, %s1821_s19  }
  0x4c   : > { %s1383_s2 = sshll.u32 (!%p1935_p8), %s2009_s0, 3  ;;  %s279_s7 = scalar_lea.sflag (!%p1935_p8), [#allocation3], %s2009_s0 }
  0x4d   : > { %s2015_s20 = scalar_lea.vmem (!%p1935_p8), [#allocation2], %s1383_s2 }
  0x50   : > { %1796 = dma.done.wait (%p1925_p4), %s279_s7, 128  }
  0x51   : > { %1798 = vsyncadd (%p1925_p4), %s279_s7, 4294967168  ;;  %s287_s28 = sand.u32 1, %s1916_s24   ;;  %s290_s29 = scalar_lea.vmem [#allocation5], %s2009_s0 }
  0x52   : > { %s288_s17 = scalar_lea.sflag [#allocation6], %s287_s28 }
  0x53   : > { %1800 = dma.done.wait (%p1925_p4), %s288_s17, 16  }
  0x54   : > { %1802 = vsyncadd (%p1925_p4), %s288_s17, 4294967280 }
  0x55   : > { %1804 = dma.done.wait (%p61_p1), [#allocation6], 1536  }
  0x56   : > { %1806 = vsyncadd (%p61_p1), [#allocation6], 4294965760  ;;  %v1844_v0 = vmov 0.0   ;;  %vm1845_vm0 = vmmov 0   ;;  %v429_v1 = vld [vmem:[#allocation7 + $0x38] sm:$0xff]  ;;  %v428_v3 = vld [vmem:[#allocation7 + $0x30] sm:$0xff] }
  0x57   : > { %1461 = vmatprep.subr.mxu1 %v1844_v0  ;;  %1450 = vmatprep.subr.mxu0 %v1844_v0  ;;  %v343_v2 = vld [vmem:[#allocation7 + $0x18] sm:$0xff]  ;;  %v342_v4 = vld [vmem:[#allocation7 + $0x10] sm:$0xff]  ;;  %v427_v5 = vld [vmem:[#allocation7 + $0x28] sm:$0xff]  ;;  %vm351_vm1 = vcmask 261120   ;;  %vm591_vm2 = vcmask 64512   ;;  %s1846_s12 = smov 120  }
  0x58   : > { %1469 = vmatprep.mubr.msk.f32.mxu1 %vm1845_vm0, %v1844_v0  ;;  %1458 = vmatprep.mubr.msk.f32.mxu0 %vm1845_vm0, %v1844_v0  ;;  %v341_v6 = vld [vmem:[#allocation7 + $0x8] sm:$0xff]  ;;  %v426_v7 = vld [vmem:[#allocation7 + $0x20] sm:$0xff]  ;;  %v512_v18 = vld [vmem:[#allocation7 + $0x58] sm:$0xff]  ;;  %vm692_vm3 = vcmask 1043456   ;;  %s1386_s8 = sshll.u32 %s2009_s0, 5  ;;  %s1847_s25 = smov 112  }
  0x59   : > { %1462 = vmatpush3.msra.mxu1 %v429_v1  ;;  %1451 = vmatpush3.msra.mxu0 %v343_v2  ;;  %v340_v8 = vld [vmem:[#allocation7] sm:$0xff]  ;;  %v338_v9 = vld [vmem:[%s2015_s20] sm:$0xff]  ;;  %s2096_s10 = scalar_lea.vmem [#allocation9], %s1386_s8  ;;  %s1848_s13 = smov 104  }
  0x5a   : > { %1463 = vmatprep.subr.mxu1 %v1844_v0  ;;  %1452 = vmatprep.subr.mxu0 %v1844_v0  ;;  %v1390_v10 = vld [vmem:[%s2246_s3 + $0x1] ss:$0 sm:$0xff]  ;;  %v1387_v11 = vld [vmem:[%s2246_s3] ss:$0 sm:$0xff]  ;;  %v511_v19 = vld [vmem:[#allocation7 + $0x50] sm:$0xff]  ;;  %s1849_s30 = smov 8  }
  0x5b   : > { %1464 = vmatpush3.msra.mxu1 %v428_v3  ;;  %1453 = vmatpush3.msra.mxu0 %v342_v4  ;;  %v510_v20 = vld [vmem:[#allocation7 + $0x48] sm:$0xff]  ;;  %v509_v21 = vld [vmem:[#allocation7 + $0x40] sm:$0xff]  ;;  %v1393_v32 = vld [vmem:[%s2246_s3 + $0x2] ss:$0 sm:$0xff]  ;;  %s1850_s14 = smov 16   ;;  %s1418_s7 = sshll.u32 %s1829_s21, 9 }
  0x5c   : > { %1465 = vmatprep.subr.mxu1 %v1844_v0  ;;  %1454 = vmatprep.subr.mxu0 %v1844_v0  ;;  %v2082_v22 = vld [vmem:[%s290_s29] ss:$0 sm:$0xff]  ;;  %s1213_s20 = sshll.u32 %s2096_s10, 4  ;;  %s2164_s29 = scalar_lea.hbm %s2248_s5, %s1418_s7  ;;  %s2166_s20 = int_to_ptr.vmem [resolvable:$true] %s1213_s20 }
  0x5d   : > { %1466 = vmatpush3.msra.mxu1 %v427_v5  ;;  %1455 = vmatpush3.msra.mxu0 %v341_v6  ;;  %s1184_s24 = scalar_lea.sflag [#allocation10], %s2009_s0  ;;  %s1719_s26 = scalar_lea.vmem %s2166_s20, 512 }
  0x5e   : > { %1467 = vmatprep.subr.mxu1 %v1844_v0  ;;  %1456 = vmatprep.subr.mxu0 %v1844_v0  ;;  %p1720_p1 = scmp.ne.s32.totalorder %s2166_s20, %s1719_s26  ;;  %s1851_s9 = smov [#allocation9]  }
  0x5f   : > { %1468 = vmatpush3.msra.mxu1 %v426_v7  ;;  %1457 = vmatpush3.msra.mxu0 %v340_v8  ;;  %s1723_s11 = sshll.u32 %s1851_s9, 4  ;;  %s1724_s11 = int_to_ptr.vmem [resolvable:$false] %s1723_s11 }
  0x60   : > { %1470 = vmatmul.mubr.msk.f32.vlgmr.msra.gmra.mxu1 %vm351_vm1, %v338_v9  ;;  %1459 = vmatmul.mubr.msk.f32.vlgmr.msra.gmra.mxu0 %vm351_vm1, %v338_v9  ;;  %p1721_p4 = pnand %p1720_p1, %p1968_p0  ;;  %p1726_p5 = scmp.lt.s32.totalorder %s2166_s20, %s1724_s11 }
  0x61   : > { %1483 = vmatprep.subr.mxu1 %v1844_v0  ;;  %1485 = vmatprep.mubr.msk.f32.mxu1 %vm1845_vm0, %v1844_v0 }
  0x62   : > { %1472 = vmatprep.subr.mxu0 %v1844_v0  ;;  %1480 = vmatprep.mubr.msk.f32.mxu0 %vm1845_vm0, %v1844_v0  ;;  %p1722_p8 = pneg %p1721_p4 }
  0x63   : > { %1473 = vmatpush3.msra.mxu0 %v512_v18 }
  0x64   : > { %1474 = vmatprep.subr.mxu0 %v1844_v0 }
  0x65   : > { %1475 = vmatpush3.msra.mxu0 %v511_v19 }
  0x66   : > { %1476 = vmatprep.subr.mxu0 %v1844_v0 }
  0x67   : > { %1477 = vmatpush3.msra.mxu0 %v510_v20 }
  0x68   : > { %1478 = vmatprep.subr.mxu0 %v1844_v0 }
  0x69   : > { %1479 = vmatpush3.msra.mxu0 %v509_v21 }
  0x6a   : > { %1481 = vmatmul.mubr.msk.f32.vlgmr.msra.gmra.mxu0 %vm351_vm1, %v338_v9  ;;  %1499 = vmatprep.subr.bf16.mxu0 %v1844_v0 }
  0x6b   : > { %1501 = vmatprep.mubr.msk.bf16.mxu0 %vm1845_vm0, %v1844_v0 }
 0x120   : > { %v504_v12 = vpop.f32.mrf.mxu1  ;;  %v421_v13 = vpop.f32.mrf.mxu0 }
 0x121   : > { %v2058_v14 = vadd.f32 %v1390_v10, %v504_v12  ;;  %v2060_v15 = vadd.f32 %v1387_v11, %v421_v13 }
 0x122   : > { %v1471_v16 = vpop.f32.mrf.mxu1  ;;  %v1460_v17 = vpop.f32.mrf.mxu0 }
 0x123   : > { %738 = vrot.lane.b32.xlu1 %v2058_v14, %s1846_s12  ;;  %1484 = vmatpush3.xpose.msk.msra.mxu1 %vm591_vm2, %v2058_v14 }
 0x124   : > { %1488 = vmatprep.subr.bf16.mxu1 %v1844_v0 }
 0x126   : > { %1486 = vmatmul.mubr.msk.f32.vlgmr.msra.gmra.mxu1 %vm591_vm2, %v2060_v15 }
 0x127   : > { %736 = vrot.lane.b32.xlu1 %v2060_v15, %s1846_s12  ;;  %1490 = vmatprep.mubr.msk.bf16.mxu1 %vm1845_vm0, %v1844_v0 }
 0x12a   : > { %v587_v33 = vpop.f32.mrf.mxu0 }
 0x12b   : > { %v588_v34 = vadd.f32 %v1393_v32, %v587_v33 }
 0x12c   : > { %v1482_v35 = vpop.f32.mrf.mxu0 }
 0x12d   : > { %v2090_v36 = vpack.c.bf16 %v588_v34, %v588_v34 }
 0x12f   : > { %v694_v37 = vsel %vm692_vm3, %v2090_v36, 0 }
 0x130   : > { %1489 = vmatpush3.bf16.msra.mxu1 %v694_v37 }
 0x131   : > { %1494 = vmatprep.subr.mxu1 %v1844_v0 }
 0x195   : > { %v739_v42 = vpop.permute.xlu1 %738 }
 0x199   : > { %v737_v43 = vpop.permute.xlu1 %736 }
 0x1e6   : > { %v664_v23 = vpop.f32.mrf.mxu1 }
 0x1e7   : > { %v674_v24 = vmul.f32 %v2082_v22, %v664_v23 }
 0x1e8   : > { %v1487_v25 = vpop.f32.mrf.mxu1 }
 0x1e9   : > { %v675_v26 = vsel %vm591_vm2, %v674_v24, -inf }
 0x1ea   : > { %676 = vmax.xlane.f32.xlu0 %v675_v26 }
 0x273   : > { %v677_v27 = vpop.xlane.xlu0 %676 }
 0x274   : > { %v678_v28 = vsub.f32 %v674_v24, %v677_v27 }
 0x276   : > { %v679_v29 = vmul.f32 1.442695, %v678_v28 }
 0x278   : > { %1621 = vpow2.f32 %v679_v29 }
 0x285   : > { %v1622_v30 = vpop.eup %1621 }
 0x286   : > { %v681_v31 = vsel %vm591_vm2, %v1622_v30, 0.0 }
 0x287   : > { %682 = vadd.xlane.f32.xlu0 %v681_v31 }
 0x310   : > { %v683_v38 = vpop.xlane.xlu0 %682 }
 0x311   : > { %1623 = vrcp.f32 %v683_v38 }
 0x31e   : > { %v1624_v39 = vpop.eup %1623 }
 0x31f   : > { %v685_v40 = vmul.f32 %v1624_v39, %v1622_v30 }
 0x321   : > { %686 = vst.msk [vmem:[%s2096_s10] sm:$0xff] %vm591_vm2, %v685_v40  ;;  %v687_v41 = vpack.c.bf16 %v685_v40, %v685_v40 }
 0x323   : > { %1491 = vmatmul.mubr.msk.bf16.vlgmr.msra.gmra.mxu1 %vm591_vm2, %v687_v41 }
 0x324   : > { %1495 = vmatpush3.xpose.msk.msra.mxu1 %vm591_vm2, %v739_v42  ;;  %1496 = vmatprep.mubr.msk.f32.mxu1 %vm1845_vm0, %v1844_v0 }
 0x325   : > { %1505 = vmatprep.subr.mxu1 %v1844_v0 }
 0x32b   : > { %1497 = vmatmul.mubr.msk.f32.vlgmr.msra.gmra.mxu1 %vm591_vm2, %v737_v43 }
 0x32c   : > { %1507 = vmatprep.mubr.msk.f32.mxu1 %vm1845_vm0, %v1844_v0 }
 0x3e3   : > { %v2108_v44 = vpop.f32.mrf.mxu1 }
 0x3e5   : > { %v1492_v45 = vpop.f32.mrf.mxu1 }
 0x3e7   : > { %v733_v46 = vpop.f32.mrf.mxu1 }
 0x3e9   : > { %v1493_v47 = vpop.f32.mrf.mxu1 }
 0x3eb   : > { %v810_v48 = vpop.f32.mrf.mxu1 }
 0x3ec   : > { %v814_v49 = vmul.f32 %v2082_v22, %v810_v48 }
 0x3ed   : > { %v1498_v50 = vpop.f32.mrf.mxu1 }
 0x3ee   : > { %v815_v51 = vsel %vm591_vm2, %v814_v49, -inf }
 0x3ef   : > { %816 = vmax.xlane.f32.xlu0 %v815_v51 }
 0x405   : > { %830 = vrot.lane.b32.xlu0 %v2090_v36, %s1846_s12  ;;  %s1725_s12 = scalar_lea.vmem %s1724_s11, 1024 }
 0x406   : > { %p1727_p7 = scmp.lt.s32.totalorder %s1725_s12, %s1719_s26 }
 0x408   : > { %p1728_p2 = por %p1727_p7, %p1726_p5 }
 0x409   : > { %880 = vrot.lane.b32.xlu0 %v2058_v14, %s1847_s25 }
 0x40a   : > { %p1729_p6 = pnand %p1728_p2, %p1722_p8 }
 0x40d   : > { %1021 = vrot.lane.b32.xlu0 %v2058_v14, %s1848_s13 }
 0x411   : > { %878 = vrot.lane.b32.xlu0 %v2060_v15, %s1847_s25 }
 0x478   : > { %v817_v52 = vpop.xlane.xlu0 %816 }
 0x479   : > { %v818_v53 = vsub.f32 %v814_v49, %v817_v52 }
 0x47b   : > { %v819_v54 = vmul.f32 1.442695, %v818_v53 }
 0x47c   : > { %v831_v55 = vpop.permute.xlu0 %830 }
 0x47d   : > { %1625 = vpow2.f32 %v819_v54  ;;  %v836_v56 = vsel %vm692_vm3, %v831_v55, 0 }
 0x47e   : > { %1500 = vmatpush3.bf16.msra.mxu0 %v836_v56 }
 0x47f   : > { %1516 = vmatprep.subr.mxu0 %v1844_v0 }
 0x480   : > { %v881_v57 = vpop.permute.xlu0 %880 }
 0x481   : > { %1506 = vmatpush3.xpose.msk.msra.mxu1 %vm591_vm2, %v881_v57 }
 0x482   : > { %1510 = vmatprep.subr.bf16.mxu1 %v1844_v0 }
 0x484   : > { %v1022_v58 = vpop.permute.xlu0 %1021 }
 0x488   : > { %v879_v59 = vpop.permute.xlu0 %878 }
 0x489   : > { %1508 = vmatmul.mubr.msk.f32.vlgmr.msra.gmra.mxu1 %vm591_vm2, %v879_v59 }
 0x48a   : > { %v1626_v60 = vpop.eup %1625  ;;  %1512 = vmatprep.mubr.msk.bf16.mxu1 %vm1845_vm0, %v1844_v0 }
 0x48b   : > { %v821_v61 = vsel %vm591_vm2, %v1626_v60, 0.0 }
 0x48c   : > { %822 = vadd.xlane.f32.xlu1 %v821_v61 }
 0x49d   : > { %1019 = vrot.lane.b32.xlu1 %v2060_v15, %s1848_s13 }
 0x515   : > { %v823_v62 = vpop.xlane.xlu1 %822 }
 0x516   : > { %1627 = vrcp.f32 %v823_v62 }
 0x519   : > { %v1020_v3 = vpop.permute.xlu1 %1019 }
 0x523   : > { %v1628_v63 = vpop.eup %1627 }
 0x524   : > { %v825_v1 = vmul.f32 %v1628_v63, %v1626_v60 }
 0x526   : > { %1401 = vst.msk [vmem:[%s2096_s10 + $0x8] sm:$0xff] %vm591_vm2, %v825_v1  ;;  %v828_v2 = vpack.c.bf16 %v825_v1, %v825_v1 }
 0x528   : > { %1502 = vmatmul.mubr.msk.bf16.vlgmr.msra.gmra.mxu0 %vm591_vm2, %v828_v2 }
 0x529   : > { %1517 = vmatpush3.xpose.msk.msra.mxu0 %vm591_vm2, %v1022_v58  ;;  %1518 = vmatprep.mubr.msk.f32.mxu0 %vm1845_vm0, %v1844_v0 }
 0x52a   : > { %1521 = vmatprep.subr.bf16.mxu0 %v1844_v0 }
 0x530   : > { %1519 = vmatmul.mubr.msk.f32.vlgmr.msra.gmra.mxu0 %vm591_vm2, %v1020_v3 }
 0x531   : > { %1523 = vmatprep.mubr.msk.bf16.mxu0 %vm1845_vm0, %v1844_v0 }
 0x549   : > { %v952_v4 = vpop.f32.mrf.mxu1 }
 0x54a   : > { %v956_v5 = vmul.f32 %v2082_v22, %v952_v4 }
 0x54b   : > { %v1509_v6 = vpop.f32.mrf.mxu1 }
 0x54c   : > { %v957_v7 = vsel %vm591_vm2, %v956_v5, -inf }
 0x54d   : > { %958 = vmax.xlane.f32.xlu0 %v957_v7 }
 0x5d6   : > { %v959_v8 = vpop.xlane.xlu0 %958 }
 0x5d7   : > { %v960_v9 = vsub.f32 %v956_v5, %v959_v8 }
 0x5d9   : > { %v961_v10 = vmul.f32 1.442695, %v960_v9 }
 0x5db   : > { %1629 = vpow2.f32 %v961_v10 }
 0x5e8   : > { %v1630_v11 = vpop.eup %1629  ;;  %v872_v12 = vpop.f32.mrf.mxu0 }
 0x5e9   : > { %v963_v13 = vsel %vm591_vm2, %v1630_v11, 0.0 }
 0x5ea   : > { %964 = vadd.xlane.f32.xlu0 %v963_v13  ;;  %v1503_v14 = vpop.f32.mrf.mxu0 }
 0x5ec   : > { %v875_v15 = vpop.f32.mrf.mxu0 }
 0x5ee   : > { %v1504_v16 = vpop.f32.mrf.mxu0 }
 0x5f0   : > { %v1093_v0 = vpop.f32.mrf.mxu0 }
 0x5f1   : > { %v1097_v17 = vmul.f32 %v2082_v22, %v1093_v0 }
 0x5f2   : > { %v1520_v18 = vpop.f32.mrf.mxu0 }
 0x5f3   : > { %v1098_v19 = vsel %vm591_vm2, %v1097_v17, -inf }
 0x5f4   : > { %1099 = vmax.xlane.f32.xlu1 %v1098_v19 }
 0x605   : > { %1112 = vrot.lane.b32.xlu1 %v2090_v36, %s1848_s13 }
 0x673   : > { %v965_v20 = vpop.xlane.xlu0 %964 }
 0x674   : > { %1631 = vrcp.f32 %v965_v20 }
 0x67d   : > { %v1100_v21 = vpop.xlane.xlu1 %1099 }
 0x67e   : > { %v1101_v23 = vsub.f32 %v1097_v17, %v1100_v21 }
 0x680   : > { %v1102_v24 = vmul.f32 1.442695, %v1101_v23 }
 0x681   : > { %v1632_v25 = vpop.eup %1631  ;;  %v1113_v26 = vpop.permute.xlu1 %1112 }
 0x682   : > { %1633 = vpow2.f32 %v1102_v24  ;;  %v1118_v27 = vsel %vm692_vm3, %v1113_v26, 0  ;;  %v967_v28 = vmul.f32 %v1632_v25, %v1630_v11 }
 0x683   : > { %1522 = vmatpush3.bf16.msra.mxu0 %v1118_v27 }
 0x684   : > { %1405 = vst.msk [vmem:[%s2096_s10 + $0x10] sm:$0xff] %vm591_vm2, %v967_v28  ;;  %v970_v33 = vpack.c.bf16 %v967_v28, %v967_v28 }
 0x68f   : > { %v1634_v22 = vpop.eup %1633 }
 0x690   : > { %v1104_v29 = vsel %vm591_vm2, %v1634_v22, 0.0 }
 0x691   : > { %1105 = vadd.xlane.f32.xlu0 %v1104_v29 }
 0x6a7   : > { %971 = vrot.lane.b32.xlu0 %v2090_v36, %s1847_s25 }
 0x6ab   : > { %1161 = vrot.lane.b32.xlu0 %v872_v12, %s1849_s30 }
 0x71a   : > { %v1106_v30 = vpop.xlane.xlu0 %1105 }
 0x71b   : > { %1635 = vrcp.f32 %v1106_v30 }
 0x71e   : > { %v972_v31 = vpop.permute.xlu0 %971 }
 0x71f   : > { %v977_v32 = vsel %vm692_vm3, %v972_v31, 0 }
 0x720   : > { %1511 = vmatpush3.bf16.msra.mxu1 %v977_v32 }
 0x723   : > { %1513 = vmatmul.mubr.msk.bf16.vlgmr.msra.gmra.mxu1 %vm591_vm2, %v970_v33 }
 0x728   : > { %v1636_v34 = vpop.eup %1635 }
 0x729   : > { %v1108_v35 = vmul.f32 %v1636_v34, %v1634_v22 }
 0x72b   : > { %1409 = vst.msk [vmem:[%s2096_s10 + $0x18] sm:$0xff] %vm591_vm2, %v1108_v35  ;;  %v1111_v36 = vpack.c.bf16 %v1108_v35, %v1108_v35 }
 0x72d   : > { %1524 = vmatmul.mubr.msk.bf16.vlgmr.msra.gmra.mxu0 %vm591_vm2, %v1111_v36 }
 0x7e3   : > { %v1013_v37 = vpop.f32.mrf.mxu1 }
 0x7e4   : > { %1165 = vrot.lane.b32.xlu0 %v1013_v37, %s1850_s14 }
 0x7e5   : > { %v1514_v38 = vpop.f32.mrf.mxu1 }
 0x7e7   : > { %v1016_v39 = vpop.f32.mrf.mxu1 }
 0x7e8   : > { %1732 = shalt.err (!%p1729_p6)
}
 0x7e9   : > { %s1733_s16 = scalar_lea.hbm %s2164_s29, 512  ;;  %s1737_s10 = scalar_lea.hbm %s2248_s5, 1024 }
 0x7ea   : > { %p1734_p9 = scmp.ne.s32.totalorder %s2164_s29, %s1733_s16  ;;  %p1738_p11 = scmp.lt.s32.totalorder %s2164_s29, %s2248_s5 }
 0x7eb   : > { %p1739_p3 = scmp.lt.s32.totalorder %s1737_s10, %s1733_s16 }
 0x7ec   : > { %p1735_p12 = pnand %p1734_p9, %p1968_p0 }
 0x7ed   : > { %p1740_p1 = por %p1739_p3, %p1738_p11 }
 0x7ee   : > { %p1736_p13 = pneg %p1735_p12 }
 0x7f0   : > { %p1741_p4 = pnand %p1740_p1, %p1736_p13 }
 0x7f2   : > { %1744 = shalt.err (!%p1741_p4)
}
 0x7f3   : > { %s1852_s14 = smov 128   ;;  %v1515_v40 = vpop.f32.mrf.mxu1  ;;  %v1154_v41 = vpop.f32.mrf.mxu0  ;;  %s1853_s7 = smov 24   ;;  %vm1173_vm4 = vcmask 130048   ;;  %vm1175_vm5 = vcmask 195584  }
 0x7f4   : > { %1536 = dma.vmem_to_hbm [thread:$0]  (%p1968_p0), %s2166_s20, 512, %s2164_s29, %s1184_s24, %s1852_s14, %s1852_s14, %s1849_s30   ;;  %v1162_v46 = vpop.permute.xlu0 %1161 }
 0x7f5   : > { %1169 = vrot.lane.b32.xlu1 %v1154_v41, %s1853_s7  ;;  %v1525_v42 = vpop.f32.mrf.mxu0  ;;  %s1413_s28 = sshll.u32 %s1829_s21, 7  ;;  %s325_s17 = scalar_lea.vmem [#allocation8], %s1383_s2  ;;  %v1172_v48 = vsel %vm591_vm2, %v2108_v44, %v1162_v46 }
 0x7f6   : > { %s1198_s26 = sshll.u32 %s325_s17, 4  ;;  %s2200_s29 = scalar_lea.hbm %s2247_s4, %s1413_s28  ;;  %s1199_s26 = int_to_ptr.vmem [resolvable:$true] %s1198_s26 }
 0x7f7   : > { %v1157_v43 = vpop.f32.mrf.mxu0  ;;  %s1179_s24 = scalar_lea.sflag [#allocation4], %s2009_s0  ;;  %s1745_s21 = scalar_lea.vmem %s1199_s26, 128 }
 0x7f8   : > { %p1746_p8 = scmp.ne.s32.totalorder %s1199_s26, %s1745_s21  ;;  %s1854_s2 = smov [#allocation8]  }
 0x7f9   : > { %v1526_v45 = vpop.f32.mrf.mxu0  ;;  %s1749_s9 = sshll.u32 %s1854_s2, 4  ;;  %s1750_s9 = int_to_ptr.vmem [resolvable:$false] %s1749_s9 }
 0x7fa   : > { %p1747_p5 = pnand %p1746_p8, %p1968_p0  ;;  %s1751_s11 = scalar_lea.vmem %s1750_s9, 256 }
 0x7fb   : > { %p1752_p2 = scmp.lt.s32.totalorder %s1199_s26, %s1750_s9  ;;  %p1753_p6 = scmp.lt.s32.totalorder %s1751_s11, %s1745_s21 }
 0x7fc   : > { %p1748_p7 = pneg %p1747_p5 }
 0x7fd   : > { %p1754_p9 = por %p1753_p6, %p1752_p2 }
 0x7ff   : > { %p1755_p12 = pnand %p1754_p9, %p1748_p7 }
 0x856   : > { %v1166_v47 = vpop.permute.xlu0 %1165 }
 0x857   : > { %v1174_v49 = vsel %vm1173_vm4, %v1172_v48, %v1166_v47 }
 0x867   : > { %v1170_v50 = vpop.permute.xlu1 %1169 }
 0x868   : > { %v1176_v51 = vsel %vm1175_vm5, %v1174_v49, %v1170_v50 }
 0x869   : > { %1177 = vst.msk [vmem:[%s325_s17] sm:$0xff] %vm351_vm1, %v1176_v51 }
 0x86a   : > { %1758 = shalt.err (!%p1755_p12)
}
 0x86b   : > { %s1759_s12 = scalar_lea.hbm %s2200_s29, 128  ;;  %s1763_s6 = scalar_lea.hbm %s2247_s4, 256 }
 0x86c   : > { %p1760_p13 = scmp.ne.s32.totalorder %s2200_s29, %s1759_s12  ;;  %p1764_p1 = scmp.lt.s32.totalorder %s2200_s29, %s2247_s4 }
 0x86d   : > { %p1765_p4 = scmp.lt.s32.totalorder %s1763_s6, %s1759_s12 }
 0x86e   : > { %p1761_p11 = pnand %p1760_p13, %p1968_p0 }
 0x86f   : > { %p1766_p8 = por %p1765_p4, %p1764_p1 }
 0x870   : > { %p1762_p3 = pneg %p1761_p11 }
 0x872   : > { %p1767_p5 = pnand %p1766_p8, %p1762_p3 }
 0x874   : > { %1770 = shalt.err (!%p1767_p5)
}
 0x875   : > { %1535 = dma.vmem_to_hbm [thread:$0]  (%p1968_p0), %s1199_s26, 128, %s2200_s29, %s1179_s24  }
 0x876 PF: > { %s1228_s25 = sand.u32 1, %s1817_s18   ;;  %p2266_p7 = scmp.ne.s32.totalorder %s2255_s27, 0 }
 0x877   : > { %s1229_s13 = scalar_lea.sflag [#allocation4], %s1228_s25 }
 0x878   : > { %p1551_p2 = pnand %p1378_p10, %p2266_p7 }
 0x87a   : > { %p1552_p6 = pneg %p1551_p2 }
 0x87c   : > { %1808 = dma.done.wait (%p1552_p6), %s1229_s13, 128  }
 0x87d   : > { %1810 = vsyncadd (%p1552_p6), %s1229_s13, 4294967168  ;;  %s1238_s14 = scalar_lea.sflag [#allocation10], %s1228_s25 }
 0x87e   : > { %1812 = dma.done.wait (%p1552_p6), %s1238_s14, 512  }
 0x87f   : > { %1814 = vsyncadd (%p1552_p6), %s1238_s14, 4294966784  ;;  %s28_s23 = sadd.s32 1, %s1837_s23   ;;  %s2267_s15 = sld [smem:[#allocation16_spill]] }
 0x880   : > { %p25_p9 = scmp.ge.s32.totalorder %s28_s23, 4   ;;  %s2268_s20 = sld [smem:[#allocation18_spill]] }
 0x881   : > { %s2269_s7 = sld [smem:[#allocation17_spill]]  ;;  %s2270_s18 = smov %s1821_s19 }
 0x882   : > { %s2272_s21 = smov %s1833_s22 }
 0x883   :  { %27 = sbr.rel (!%p25_p9) target bundleno = 13 (0xd), region = 126 }
 0x885   : > { %s2271_s19 = smov %s2267_s15 }
 0x887   : > { %s2273_s22 = smov %s2269_s7 }
 0x888   :  { %1243 = vsyncpa [#allocation3], 1 }
 0x889   :  { %1245 = vsyncpa [#allocation3 + $0x1], 1 }
 0x88a   :  { %1246 = vsyncpa [#allocation6], 1 }
 0x88b   :  { %1248 = vsyncpa [#allocation6 + $0x1], 1 }
 0x88c   :  { %1249 = vsyncpa [#allocation4], 1 }
 0x88d   :  { %1251 = vsyncpa [#allocation4 + $0x1], 1 }
 0x88e   :  { %1252 = vsyncpa [#allocation10], 1 }
 0x88f   :  { %1254 = vsyncpa [#allocation10 + $0x1], 1 }

</bundles_post_ra>
